<compile_context>
chip_gen: v5e
topology: v5e:2x2
jax: 0.10.0
libtpu: 0.0.40
codegen_flags: <defaults>
</compile_context>

<pallas_src>
import math
import jax
import jax.numpy as jnp
from jax.experimental import pallas as pl
from jax.experimental.pallas import tpu as pltpu


def _rup(x, m):
    return -(-x // m) * m


def _vmem_capacity_bytes():
    try:
        info = pltpu.get_tpu_info()
        for attr in ("vmem_capacity_bytes", "vmem_size_bytes", "vmem_bytes"):
            v = getattr(info, attr, None)
            if isinstance(v, int) and v > 0:
                return v
    except Exception:
        pass
    return 64 << 20          # conservative fallback: v7x per-TensorCore VMEM


def _num_tensorcores():
    try:
        info = pltpu.get_tpu_info()
        for attr in ("num_cores", "tensorcore_count", "num_tensorcores",
                     "cores_per_chip"):
            v = getattr(info, attr, None)
            if isinstance(v, int) and v > 0:
                return v
    except Exception:
        pass
    try:
        v = getattr(jax.devices()[0], "num_cores", None)
        if isinstance(v, int) and v > 0:
            return v
    except Exception:
        pass
    return 1


def _transition_kernel(x_ref, ss_ref, w_ref, b_ref, o_ref):
    # x_ref : (1, th, 2, Wo, 2C)  NHWC block; H split into (out-row, 2),
    #                             the W-pair of each window folded into lanes.
    # ss_ref: (2, 2C)  f32        row 0 = folded BN scale (tiled x2), row 1 = shift
    # w_ref : (2C, CoutP)         1x1 conv weight stacked x2, pre-scaled by 0.25
    # b_ref : (1, CoutP) f32      conv bias (zero-padded to CoutP)
    # o_ref : (1, th, Wo, CoutP)
    _, th, wo, coutp = o_ref.shape
    c2 = x_ref.shape[-1]
    scale = ss_ref[0:1, :]
    shift = ss_ref[1:2, :]

    # BN + ReLU on both window rows, summed post-ReLU (the pool commutes with
    # the linear conv; the 0.25 factor lives in w_ref).  f32 VPU math.
    x0 = x_ref[0, :, 0, :, :].astype(jnp.float32)
    x1 = x_ref[0, :, 1, :, :].astype(jnp.float32)
    h = (jnp.maximum(x0 * scale + shift, 0.0) +
         jnp.maximum(x1 * scale + shift, 0.0))                 # (th, wo, 2C) f32

    # Single MXU matmul; K = 2C performs the W-pair sum for free.
    # The (th, wo) -> th*wo merge is layout-trivial because the tile picker
    # guarantees th == 1 or wo % 8 == 0.
    h2 = h.reshape(th * wo, c2).astype(w_ref.dtype)
    out = jnp.dot(h2, w_ref[...], preferred_element_type=jnp.float32)
    out = out + b_ref[...]
    o_ref[0] = out.reshape(th, wo, coutp).astype(o_ref.dtype)


def _pick_tile_rows(N, Ho, Wo, C2, CoutP, in_item, w_item, out_item,
                    budget_bytes, n_cores):
    """Output rows per grid step.  Every BlockSpec is counted double-buffered
    (Pallas default, incl. the resident weight/scale/bias blocks), with
    lane(128)/sublane(8) padding, plus the kernel's f32 temporaries.  th is
    capped to 1 when Wo is not sublane-aligned so the in-kernel
    (th, Wo) -> th*Wo merge stays a pure relabel."""
    c2_l = _rup(C2, 128)
    co_l = _rup(CoutP, 128)
    wo_s = _rup(Wo, 8)

    def need(th):
        in_b = 2 * th * 2 * wo_s * c2_l * in_item      # input block, x2 buffers
        out_b = 2 * th * wo_s * co_l * out_item        # output block, x2 buffers
        w_b = 2 * _rup(C2, 8) * co_l * w_item          # resident weight, still x2
        ss_b = 2 * 8 * c2_l * 4                        # scale/shift, x2
        bias_b = 2 * 8 * co_l * 4                      # bias, x2
        tmp = th * wo_s * (c2_l + co_l) * 4            # in-kernel f32 temporaries
        return in_b + out_b + w_b + ss_b + bias_b + tmp

    th = Ho if Wo % 8 == 0 else 1
    while th > 1 and need(th) > budget_bytes:
        th = (th + 1) // 2

    n_rt = pl.cdiv(Ho, th)
    # Megacore: on multi-TC parts prefer an even total step count when the
    # grid is small (an odd, tiny grid leaves one TensorCore idle on the tail).
    if n_cores >= 2 and (N * n_rt) % 2 == 1 and N * n_rt < 16 and th > 1:
        n_rt = n_rt + 1
        th = pl.cdiv(Ho, n_rt)
        n_rt = pl.cdiv(Ho, th)
    return th, n_rt, need(th)


def transition_layer_nhwc(x_nhwc, bn_gamma, bn_beta, bn_mean, bn_var,
                          conv_w, conv_b, *, eps=1e-5,
                          matmul_dtype=jnp.bfloat16, out_dtype=None,
                          vmem_budget_bytes=None):
    """NHWC-native path (no repack, no output transpose).
    x_nhwc: (N, H, W, C) -> (N, H//2, W//2, Cout) in out_dtype (defaults to
    x_nhwc.dtype).  Pass bf16 activations to halve activation HBM traffic."""
    N, H, W, C = x_nhwc.shape
    Cout = conv_w.shape[0]
    Ho, Wo = H // 2, W // 2
    out_dtype = x_nhwc.dtype if out_dtype is None else out_dtype
    C2 = 2 * C

    # Lane-dense Cout padding only when Cout is large enough that the padded
    # writeback stays cheap relative to the unmasked-store win.
    if Cout % 128 == 0 or Cout < 64:
        CoutP = Cout
    else:
        CoutP = _rup(Cout, 128)

    # Fold BN into per-channel scale/shift; tile x2 to match the lane packing.
    scale = (bn_gamma.astype(jnp.float32) /
             jnp.sqrt(bn_var.astype(jnp.float32) + eps))
    shift = bn_beta.astype(jnp.float32) - bn_mean.astype(jnp.float32) * scale
    ss = jnp.stack([jnp.tile(scale, 2), jnp.tile(shift, 2)])        # (2, 2C) f32

    # Conv weight (Cout,C,1,1) -> (C,Cout), stacked x2 along K, pool factor
    # 0.25 folded in, Cout zero-padded, cast to the MXU feed dtype.
    w = conv_w.reshape(Cout, C).T.astype(jnp.float32)               # (C, Cout)
    w2 = jnp.tile(w, (2, 1)) * 0.25                                  # (2C, Cout)
    w2 = jnp.pad(w2, ((0, 0), (0, CoutP - Cout))).astype(matmul_dtype)
    b = jnp.pad(conv_b.astype(jnp.float32),
                (0, CoutP - Cout)).reshape(1, CoutP)

    # FREE row-major reshape (bitcast, no HBM pass): (N,H,W,C)->(N,Ho,2,Wo,2C).
    if H != 2 * Ho or W != 2 * Wo:          # odd H/W: PyTorch AvgPool2d floors
        x_nhwc = x_nhwc[:, :2 * Ho, :2 * Wo, :]
    x5 = x_nhwc.reshape(N, Ho, 2, Wo, C2)

    in_item = jnp.dtype(x_nhwc.dtype).itemsize
    w_item = jnp.dtype(matmul_dtype).itemsize
    out_item = jnp.dtype(out_dtype).itemsize

    cap = _vmem_capacity_bytes()
    budget = (vmem_budget_bytes if vmem_budget_bytes is not None
              else min(int(cap * 0.55), 96 << 20))
    n_cores = _num_tensorcores()
    th, n_rt, vmem_need = _pick_tile_rows(N, Ho, Wo, C2, CoutP, in_item,
                                          w_item, out_item, budget, n_cores)
    # Always set an explicit limit (generation defaults differ: 16/32 MiB).
    vmem_limit = int(min(max(vmem_need + (4 << 20), 32 << 20), int(cap * 0.9)))

    flops = 2 * N * Ho * Wo * C2 * CoutP + 6 * N * Ho * Wo * C2
    bytes_accessed = (N * Ho * 2 * Wo * C2 * in_item
                      + C2 * CoutP * w_item
                      + N * Ho * Wo * CoutP * out_item)

    out = pl.pallas_call(
        _transition_kernel,
        out_shape=jax.ShapeDtypeStruct((N, Ho, Wo, CoutP), out_dtype),
        grid_spec=pltpu.PrefetchScalarGridSpec(
            num_scalar_prefetch=0,
            grid=(N, n_rt),
            in_specs=[
                pl.BlockSpec((1, th, 2, Wo, C2), lambda n, r: (n, r, 0, 0, 0)),
                pl.BlockSpec((2, C2), lambda n, r: (0, 0)),
                pl.BlockSpec((C2, CoutP), lambda n, r: (0, 0)),
                pl.BlockSpec((1, CoutP), lambda n, r: (0, 0)),
            ],
            out_specs=pl.BlockSpec((1, th, Wo, CoutP), lambda n, r: (n, r, 0, 0)),
        ),
        compiler_params=pltpu.CompilerParams(
            dimension_semantics=("parallel", "parallel"),
            vmem_limit_bytes=vmem_limit),
        cost_estimate=pl.CostEstimate(flops=int(flops), transcendentals=0,
                                      bytes_accessed=int(bytes_accessed)),
    )(x5, ss, w2, b)

    if CoutP != Cout:
        out = out[..., :Cout]
    return out


def transition_layer(x_nchw, bn_gamma, bn_beta, bn_mean, bn_var, conv_w, conv_b,
                     *, eps=1e-5, matmul_dtype=jnp.bfloat16, out_dtype=None,
                     vmem_budget_bytes=None):
    """PyTorch-parity entry: (N, C, H, W) in, (N, Cout, H//2, W//2) out."""
    # TODO(synk): keep activations NHWC end-to-end upstream; these two
    # transposes are layout-only HBM passes that exist purely for NCHW parity
    # and are the remaining bandwidth overhead of this (mem-bound) layer.
    x_nhwc = jnp.transpose(x_nchw, (0, 2, 3, 1))
    y = transition_layer_nhwc(x_nhwc, bn_gamma, bn_beta, bn_mean, bn_var,
                              conv_w, conv_b, eps=eps,
                              matmul_dtype=matmul_dtype, out_dtype=out_dtype,
                              vmem_budget_bytes=vmem_budget_bytes)
    return jnp.transpose(y, (0, 3, 1, 2))


def _reference(x_nchw, bn_gamma, bn_beta, bn_mean, bn_var, conv_w, conv_b,
               eps=1e-5):
    # Pure-JAX reference mirroring the PyTorch forward (BN in eval mode).
    scale = bn_gamma / jnp.sqrt(bn_var + eps)
    shift = bn_beta - bn_mean * scale
    h = x_nchw * scale[None, :, None, None] + shift[None, :, None, None]
    h = jnp.maximum(h, 0.0)
    y = jnp.einsum('nchw,oc->nohw', h, conv_w.reshape(conv_w.shape[0], -1))
    y = y + conv_b[None, :, None, None]
    N, Co, H, W = y.shape
    y = y.reshape(N, Co, H // 2, 2, W // 2, 2).mean(axis=(3, 5))
    return y


if __name__ == "__main__":
    # Module config: input_channels=4, theta=0.5 -> out_channels=2
    input_channels = 4
    theta = 0.5
    out_channels = int(math.floor(theta * input_channels))

    key = jax.random.PRNGKey(0)
    kx, kg, kb, km, kv, kw, kcb, kx2 = jax.random.split(key, 8)

    x = jax.random.normal(kx, (2, input_channels, 16, 16), dtype=jnp.float32)

    # BatchNorm2d params / running stats (inference mode), deterministic.
    bn_gamma = 1.0 + 0.1 * jax.random.normal(kg, (input_channels,), jnp.float32)
    bn_beta = 0.1 * jax.random.normal(kb, (input_channels,), jnp.float32)
    bn_mean = 0.1 * jax.random.normal(km, (input_channels,), jnp.float32)
    bn_var = 1.0 + 0.1 * jax.random.uniform(kv, (input_channels,), jnp.float32)

    # Conv2d(input_channels, out_channels, kernel_size=1), bias=True (default).
    conv_w = jax.random.normal(kw, (out_channels, input_channels, 1, 1),
                               jnp.float32) * (1.0 / math.sqrt(input_channels))
    conv_b = 0.1 * jax.random.normal(kcb, (out_channels,), jnp.float32)

    y_ref = _reference(x, bn_gamma, bn_beta, bn_mean, bn_var, conv_w, conv_b)

    # --- f32 storage + f32 MXU: exact vs reference (NCHW-parity wrapper) ---
    y = transition_layer(x, bn_gamma, bn_beta, bn_mean, bn_var, conv_w, conv_b,
                         matmul_dtype=jnp.float32)
    y = jax.block_until_ready(y)
    assert y.shape == (2, out_channels, 8, 8)
    assert jnp.allclose(y, y_ref, atol=1e-5, rtol=1e-5)

    # --- bf16 activations + bf16 MXU via the NHWC-native entry (no repack,
    #     no output transpose; halves activation HBM traffic) ---
    x_nhwc16 = jnp.transpose(x, (0, 2, 3, 1)).astype(jnp.bfloat16)
    y16 = transition_layer_nhwc(x_nhwc16, bn_gamma, bn_beta, bn_mean, bn_var,
                                conv_w, conv_b)
    y16 = jax.block_until_ready(y16)
    y_ref_nhwc = jnp.transpose(y_ref, (0, 2, 3, 1))
    assert y16.shape == (2, 8, 8, out_channels)
    assert jnp.allclose(y16.astype(jnp.float32), y_ref_nhwc,
                        atol=1e-1, rtol=1e-1)

    # --- ragged spatial dims (Ho=3, Wo=5): exercises the Wo%8!=0 fallback ---
    x2 = jax.random.normal(kx2, (1, input_channels, 6, 10), dtype=jnp.float32)
    y2 = transition_layer(x2, bn_gamma, bn_beta, bn_mean, bn_var, conv_w,
                          conv_b, matmul_dtype=jnp.float32)
    y2 = jax.block_until_ready(y2)
    y2_ref = _reference(x2, bn_gamma, bn_beta, bn_mean, bn_var, conv_w, conv_b)
    assert y2.shape == (1, out_channels, 3, 5)
    assert jnp.allclose(y2, y2_ref, atol=1e-5, rtol=1e-5)

    print("KERNEL_OK")
</pallas_src>

<mosaic_0001>
module attributes {stable_mosaic.version = 11 : i64} {
  func.func @_transition_kernel(%arg0: i32, %arg1: i32, %arg2: memref<1x8x2x8x8xf32, #tpu.memory_space<vmem>>, %arg3: memref<2x8xf32, #tpu.memory_space<vmem>>, %arg4: memref<8x2xf32, #tpu.memory_space<vmem>>, %arg5: memref<1x2xf32, #tpu.memory_space<vmem>>, %arg6: memref<1x8x8x2xf32, #tpu.memory_space<vmem>>) attributes {dimension_semantics = [#tpu.dimension_semantics<parallel>, #tpu.dimension_semantics<parallel>], iteration_bounds = array<i64: 2, 1>, scalar_prefetch = 0 : i64, scratch_operands = 0 : i64, tpu.core_type = #tpu.core_type<tc>, window_params = [{transform_indices = @transform_0, window_bounds = array<i64: 1, 8, 2, 8, 8>}, {pipeline_mode = #tpu.pipeline_mode<synchronous>, transform_indices = @transform_1, window_bounds = array<i64: 2, 8>}, {pipeline_mode = #tpu.pipeline_mode<synchronous>, transform_indices = @transform_2, window_bounds = array<i64: 8, 2>}, {pipeline_mode = #tpu.pipeline_mode<synchronous>, transform_indices = @transform_3, window_bounds = array<i64: 1, 2>}, {transform_indices = @transform_4, window_bounds = array<i64: 1, 8, 8, 2>}]} {
    %c0 = arith.constant 0 : index
    %c0_0 = arith.constant 0 : index
    %0 = vector.load %arg3[%c0, %c0_0] : memref<2x8xf32, #tpu.memory_space<vmem>>, vector<1x8xf32>
    %c1 = arith.constant 1 : index
    %c0_1 = arith.constant 0 : index
    %1 = vector.load %arg3[%c1, %c0_1] : memref<2x8xf32, #tpu.memory_space<vmem>>, vector<1x8xf32>
    %c0_2 = arith.constant 0 : index
    %c0_3 = arith.constant 0 : index
    %c0_4 = arith.constant 0 : index
    %c0_5 = arith.constant 0 : index
    %c0_6 = arith.constant 0 : index
    %2 = vector.load %arg2[%c0_2, %c0_3, %c0_4, %c0_5, %c0_6] : memref<1x8x2x8x8xf32, #tpu.memory_space<vmem>>, vector<1x8x1x8x8xf32>
    %3 = vector.shape_cast %2 : vector<1x8x1x8x8xf32> to vector<8x8x8xf32>
    %c0_7 = arith.constant 0 : index
    %c0_8 = arith.constant 0 : index
    %c1_9 = arith.constant 1 : index
    %c0_10 = arith.constant 0 : index
    %c0_11 = arith.constant 0 : index
    %4 = vector.load %arg2[%c0_7, %c0_8, %c1_9, %c0_10, %c0_11] : memref<1x8x2x8x8xf32, #tpu.memory_space<vmem>>, vector<1x8x1x8x8xf32>
    %5 = vector.shape_cast %4 : vector<1x8x1x8x8xf32> to vector<8x8x8xf32>
    %6 = vector.shape_cast %0 : vector<1x8xf32> to vector<1x1x8xf32>
    %7 = vector.broadcast %6 : vector<1x1x8xf32> to vector<8x8x8xf32>
    %8 = arith.mulf %3, %7 : vector<8x8x8xf32>
    %9 = vector.shape_cast %1 : vector<1x8xf32> to vector<1x1x8xf32>
    %10 = vector.broadcast %9 : vector<1x1x8xf32> to vector<8x8x8xf32>
    %11 = arith.addf %8, %10 : vector<8x8x8xf32>
    %cst = arith.constant 0.000000e+00 : f32
    %12 = vector.broadcast %cst : f32 to vector<8x8x8xf32>
    %13 = arith.maximumf %11, %12 : vector<8x8x8xf32>
    %14 = vector.shape_cast %0 : vector<1x8xf32> to vector<1x1x8xf32>
    %15 = vector.broadcast %14 : vector<1x1x8xf32> to vector<8x8x8xf32>
    %16 = arith.mulf %5, %15 : vector<8x8x8xf32>
    %17 = vector.shape_cast %1 : vector<1x8xf32> to vector<1x1x8xf32>
    %18 = vector.broadcast %17 : vector<1x1x8xf32> to vector<8x8x8xf32>
    %19 = arith.addf %16, %18 : vector<8x8x8xf32>
    %cst_12 = arith.constant 0.000000e+00 : f32
    %20 = vector.broadcast %cst_12 : f32 to vector<8x8x8xf32>
    %21 = arith.maximumf %19, %20 : vector<8x8x8xf32>
    %22 = arith.addf %13, %21 : vector<8x8x8xf32>
    %23 = vector.shape_cast %22 : vector<8x8x8xf32> to vector<64x8xf32>
    %c0_13 = arith.constant 0 : index
    %c0_14 = arith.constant 0 : index
    %24 = vector.load %arg4[%c0_13, %c0_14] : memref<8x2xf32, #tpu.memory_space<vmem>>, vector<8x2xf32>
    %cst_15 = arith.constant dense<0.000000e+00> : vector<64x2xf32>
    %25 = tpu.matmul %23, %24, %cst_15 {dimension_numbers = #tpu.dot_dimension_numbers<[1], [0], [0], [1], [0, 0, 1, 1], [], []>} : vector<64x8xf32>, vector<8x2xf32>, vector<64x2xf32> -> vector<64x2xf32>
    %c0_16 = arith.constant 0 : index
    %c0_17 = arith.constant 0 : index
    %26 = vector.load %arg5[%c0_16, %c0_17] : memref<1x2xf32, #tpu.memory_space<vmem>>, vector<1x2xf32>
    %27 = vector.broadcast %26 : vector<1x2xf32> to vector<64x2xf32>
    %28 = arith.addf %25, %27 : vector<64x2xf32>
    %29 = vector.shape_cast %28 : vector<64x2xf32> to vector<8x8x2xf32>
    %c0_18 = arith.constant 0 : index
    %c0_19 = arith.constant 0 : index
    %c0_20 = arith.constant 0 : index
    %c0_21 = arith.constant 0 : index
    %30 = vector.load %arg6[%c0_18, %c0_19, %c0_20, %c0_21] : memref<1x8x8x2xf32, #tpu.memory_space<vmem>>, vector<1x8x8x2xf32>
    %31 = vector.shape_cast %30 : vector<1x8x8x2xf32> to vector<8x8x2xf32>
    %32 = vector.shape_cast %29 : vector<8x8x2xf32> to vector<1x8x8x2xf32>
    tpu.vector_store %arg6[%c0_18, %c0_19, %c0_20, %c0_21], %32 {strides = array<i32>} : memref<1x8x8x2xf32, #tpu.memory_space<vmem>>, vector<1x8x8x2xf32>,
    return
  }
  func.func @transform_0(%arg0: i32, %arg1: i32) -> (i32, i32, i32, i32, i32) {
    %c0_i32 = arith.constant 0 : i32
    %c0_i32_0 = arith.constant 0 : i32
    %c0_i32_1 = arith.constant 0 : i32
    %c0_i32_2 = arith.constant 0 : i32
    return %arg0, %arg1, %c0_i32, %c0_i32_0, %c0_i32_1 : i32, i32, i32, i32, i32
  }
  func.func @transform_1(%arg0: i32, %arg1: i32) -> (i32, i32) {
    %c0_i32 = arith.constant 0 : i32
    %c0_i32_0 = arith.constant 0 : i32
    %c0_i32_1 = arith.constant 0 : i32
    return %c0_i32, %c0_i32_0 : i32, i32
  }
  func.func @transform_2(%arg0: i32, %arg1: i32) -> (i32, i32) {
    %c0_i32 = arith.constant 0 : i32
    %c0_i32_0 = arith.constant 0 : i32
    %c0_i32_1 = arith.constant 0 : i32
    return %c0_i32, %c0_i32_0 : i32, i32
  }
  func.func @transform_3(%arg0: i32, %arg1: i32) -> (i32, i32) {
    %c0_i32 = arith.constant 0 : i32
    %c0_i32_0 = arith.constant 0 : i32
    %c0_i32_1 = arith.constant 0 : i32
    return %c0_i32, %c0_i32_0 : i32, i32
  }
  func.func @transform_4(%arg0: i32, %arg1: i32) -> (i32, i32, i32, i32) {
    %c0_i32 = arith.constant 0 : i32
    %c0_i32_0 = arith.constant 0 : i32
    %c0_i32_1 = arith.constant 0 : i32
    return %arg0, %arg1, %c0_i32, %c0_i32_0 : i32, i32, i32, i32
  }
}

</mosaic_0001>

<bundles_post_ra>
// kernel: tpu_custom_call.1
= control target key start
LH: loop header
LB: loop body
LE: loop exit
PB: predicated region body
PF: predicated region fallthrough
CT: control target
= control target key end

     0   :  { %9 = vsyncpa [#allocation3], 0  ;;  %s874_s0 = inlined_call_operand.hbm [shape: f32[2,8,2,8,8], index: 0, kind: input, shape index: {}]   ;;  %s875_s1 = inlined_call_operand.vmem [shape: f32[2,8], index: 1, kind: input, shape index: {}]   ;;  %s876_s2 = inlined_call_operand.vmem [shape: f32[8,2], index: 2, kind: input, shape index: {}]   ;;  %s877_s3 = inlined_call_operand.vmem [shape: f32[1,2], index: 3, kind: input, shape index: {}]   ;;  %s878_s4 = inlined_call_operand.vmem [shape: f32[2,8,8,2], index: 4, kind: output, shape index: {}]  }
   0x1   :  { %11 = vsyncpa [#allocation3 + $0x1], 0  ;;  %s704_s15 = smov 0   ;;  %s706_s16 = smov 0  }
   0x2   :  { %s708_s17 = smov 0   ;;  %s710_s18 = smov 0  }
   0x3   :  { %s712_s19 = smov 0   ;;  %s714_s20 = smov 0  }
   0x4 LB: > { %s501_s21 = sadd.s32 4294967295, %s675_s20   ;;  %s29_s22 = sadd.s32 1, %s671_s19  ;;  %s675_s20 = sphi %s714_s20, %s17_s20   ;;  %s671_s19 = sphi %s712_s19, %s885_s19   ;;  %s667_s18 = sphi %s710_s18, %s884_s18   ;;  %s663_s17 = sphi %s708_s17, %s883_s17   ;;  %s659_s16 = sphi %s706_s16, %s882_s16   ;;  %s655_s15 = sphi %s704_s15, %s881_s15  }
   0x5   : > { %p31_p0 = scmp.ge.s32.totalorder %s29_s22, 2  ;;  %s38_s23 = sadd.s32 1, %s663_s17 }
   0x6   : > { %p45_p1 = scmp.ne.s32.totalorder %s663_s17, %s659_s16  ;;  %p46_p2 = scmp.eq.s32.totalorder %s675_s20, 0 }
   0x7   : > { %s887_s22 = smov (%p31_p0, %s29_s22), 0  ;;  %p51_p4 = scmp.ne.s32.totalorder %s659_s16, %s655_s15 }
   0x8   : > { %p740_p3 = por %p46_p2, %p45_p1  ;;  %s33_s25 = ssub.s32 %s671_s19, %s887_s22 }
   0x9   : > { %p52_p5 = scmp.eq.s32.totalorder %s501_s21, 0  ;;  %p36_p6 = scmp.eq.s32.totalorder %s33_s25, 0 }
   0xa   : > { %p541_p8 = scmp.lt.s32.totalorder %s675_s20, 2  ;;  %s175_s28 = sand.u32 1, %s663_s17  }
   0xb   : > { %p747_p7 = por %p52_p5, %p51_p4  ;;  %s530_s29 = sshll.u32 %s671_s19, 7 }
   0xc   : > { %s753_s27 = scalar_select %p36_p6, %s663_s17, %s38_s23  }
   0xd   : > { %s505_s30 = sshll.u32 %s175_s28, 7  ;;  %s187_s7 = scalar_lea.hbm %s874_s0, %s530_s29 }
   0xe   : > { %s188_s8 = sshll.u32 %s187_s7, 4  ;;  %s179_s9 = scalar_lea.vmem [#allocation2], %s505_s30  ;;  %s189_s8 = int_to_ptr.hbm [resolvable:$true] %s188_s8 }
   0xf   : > { %s190_s10 = sshll.u32 %s179_s9, 4  ;;  %p538_p9 = pnand %p541_p8, %p740_p3  ;;  %s191_s10 = int_to_ptr.vmem [resolvable:$true] %s190_s10 }
  0x10   : > { %p508_p10 = scmp.ge.s32.totalorder %s675_s20, 1  ;;  %p198_p11 = scmp.lt.s32.totalorder %s675_s20, 3 }
  0x11   : > { %s176_s11 = scalar_lea.sflag [#allocation3], %s175_s28  ;;  %s677_s12 = smov 128  }
  0x12   : > { %s678_s13 = smov 8   ;;  %p199_p12 = pnand %p508_p10, %p198_p11 }
  0x13   : > { %540 = dma.hbm_to_vmem [thread:$0]  (!%p538_p9), %s189_s8, 2048, %s191_s10, %s176_s11, %s677_s12, %s677_s12, %s678_s13  }
  0x14   : > { %202 = sbr.rel (%p199_p12) target bundleno = 181 (0xb5), region = 36  ;;  %s204_s14 = sand.u32 (!%p199_p12), 1, %s659_s16  }
  0x15   : > { %s509_s15 = sshll.u32 (!%p199_p12), %s204_s14, 7  ;;  %s205_s21 = scalar_lea.sflag (!%p199_p12), [#allocation3], %s204_s14 }
  0x16   : > { %s765_s23 = scalar_lea.vmem (!%p199_p12), [#allocation2], %s509_s15 }
  0x19   : > { %650 = dma.done.wait (%p747_p7), %s205_s21, 2048  }
  0x1a   : > { %652 = vsyncadd (%p747_p7), %s205_s21, 4294965248  ;;  %v326_v0 = vld [vmem:[%s876_s2] sm:$0xff]  ;;  %v516_v2 = vld [vmem:[%s765_s23 + $0x48] sm:$0xff]  ;;  %vm331_vm0 = vcmask 64512   ;;  %p240_p13 = scmp.lt.s32.totalorder %s667_s18, 1  ;;  %vm397_vm1 = vcmask 15360  }
  0x1b   : > { %533 = vmatpush.msra.mxu2 %v326_v0  ;;  %534 = vmatpush.msra.mxu3 %v326_v0  ;;  %v255_v1 = vld [vmem:[%s765_s23 + $0x40] sm:$0xff]  ;;  %v518_v6 = vld [vmem:[%s765_s23 + $0x68] sm:$0xff]  ;;  %v256_v22 = vld [vmem:[%s765_s23 + $0x50] sm:$0xff] }
  0x1c   : > { %v779_v3 = vld [vmem:[%s875_s1] ss:$0 sm:$0xff]  ;;  %v784_v4 = vld [vmem:[%s875_s1 + $0x1] ss:$0 sm:$0xff]  ;;  %371 = vmatpush.msra.mxu0 %v326_v0  ;;  %532 = vmatpush.msra.mxu1 %v326_v0  ;;  %v512_v12 = vld [vmem:[%s765_s23 + $0x8] sm:$0xff]  ;;  %s889_s18 = smov (!%p240_p13, %s667_s18), 1 }
  0x1d   : > { %v257_v5 = vld [vmem:[%s765_s23 + $0x60] sm:$0xff]  ;;  %v273_v7 = vmul.f32 %v779_v3, %v255_v1  ;;  %v298_v8 = vmul.f32 %v779_v3, %v516_v2  ;;  %v300_v10 = vmul.f32 %v779_v3, %v518_v6  ;;  %v294_v15 = vmul.f32 %v779_v3, %v512_v12  ;;  %v514_v16 = vld [vmem:[%s765_s23 + $0x28] sm:$0xff]  ;;  %v517_v27 = vld [vmem:[%s765_s23 + $0x58] sm:$0xff]  ;;  %s531_s5 = sshll.u32 %s889_s18, 6 }
  0x1e   : > { %v275_v9 = vmul.f32 %v779_v3, %v257_v5  ;;  %v251_v11 = vld [vmem:[%s765_s23] sm:$0xff]  ;;  %v296_v26 = vmul.f32 %v779_v3, %v514_v16  ;;  %v258_v28 = vld [vmem:[%s765_s23 + $0x70] sm:$0xff]  ;;  %v519_v29 = vld [vmem:[%s765_s23 + $0x78] sm:$0xff]  ;;  %v274_v41 = vmul.f32 %v779_v3, %v256_v22  ;;  %v299_v42 = vmul.f32 %v779_v3, %v517_v27  ;;  %s247_s10 = scalar_lea.vmem %s878_s4, %s531_s5 }
  0x1f   : > { %v253_v13 = vld [vmem:[%s765_s23 + $0x20] sm:$0xff]  ;;  %v269_v14 = vmul.f32 %v779_v3, %v251_v11  ;;  %v282_v18 = vadd.f32 %v784_v4, %v273_v7  ;;  %v306_v19 = vadd.f32 %v784_v4, %v298_v8  ;;  %v308_v21 = vadd.f32 %v784_v4, %v300_v10  ;;  %v252_v38 = vld [vmem:[%s765_s23 + $0x10] sm:$0xff]  ;;  %v513_v43 = vld [vmem:[%s765_s23 + $0x18] sm:$0xff] }
  0x20   : > { %v271_v17 = vmul.f32 %v779_v3, %v253_v13  ;;  %v284_v20 = vadd.f32 %v784_v4, %v275_v9  ;;  %v302_v24 = vadd.f32 %v784_v4, %v294_v15  ;;  %v304_v37 = vadd.f32 %v784_v4, %v296_v26  ;;  %v254_v48 = vld [vmem:[%s765_s23 + $0x30] sm:$0xff]  ;;  %v515_v52 = vld [vmem:[%s765_s23 + $0x38] sm:$0xff] }
  0x21   : > { %v278_v23 = vadd.f32 %v784_v4, %v269_v14  ;;  %v290_v30 = vmax.f32 %v282_v18, 0.0  ;;  %v314_v31 = vmax.f32 %v306_v19, 0.0  ;;  %v316_v33 = vmax.f32 %v308_v21, 0.0 }
  0x22   : > { %v280_v25 = vadd.f32 %v784_v4, %v271_v17  ;;  %v292_v32 = vmax.f32 %v284_v20, 0.0  ;;  %v310_v35 = vmax.f32 %v302_v24, 0.0  ;;  %v312_v45 = vmax.f32 %v304_v37, 0.0 }
  0x23   : > { %v286_v34 = vmax.f32 %v278_v23, 0.0  ;;  %v322_v39 = vadd.f32 %v314_v31, %v290_v30  ;;  %v276_v46 = vmul.f32 %v779_v3, %v258_v28  ;;  %v301_v47 = vmul.f32 %v779_v3, %v519_v29 }
  0x24   : > { %v288_v36 = vmax.f32 %v280_v25, 0.0  ;;  %v324_v40 = vadd.f32 %v316_v33, %v292_v32  ;;  %v283_v49 = vadd.f32 %v784_v4, %v274_v41  ;;  %v307_v50 = vadd.f32 %v784_v4, %v299_v42 }
  0x25   : > { %v318_v44 = vadd.f32 %v310_v35, %v286_v34  ;;  %524 = vmatmul.msk.f32.vlgmr.msra.gmra.mxu2 %vm331_vm0, %v322_v39  ;;  %v270_v51 = vmul.f32 %v779_v3, %v252_v38  ;;  %v285_v54 = vadd.f32 %v784_v4, %v276_v46  ;;  %v309_v55 = vadd.f32 %v784_v4, %v301_v47 }
  0x26   : > { %526 = vmatmul.msk.f32.vlgmr.msra.gmra.mxu3 %vm331_vm0, %v324_v40  ;;  %v320_v53 = vadd.f32 %v312_v45, %v288_v36  ;;  %v295_v56 = vmul.f32 %v779_v3, %v513_v43  ;;  %v291_v57 = vmax.f32 %v283_v49, 0.0  ;;  %v315_v58 = vmax.f32 %v307_v50, 0.0 }
  0x27   : > { %520 = vmatmul.msk.f32.vlgmr.msra.gmra.mxu0 %vm331_vm0, %v318_v44  ;;  %v279_v59 = vadd.f32 %v784_v4, %v270_v51  ;;  %v272_v60 = vmul.f32 %v779_v3, %v254_v48  ;;  %v293_v61 = vmax.f32 %v285_v54, 0.0  ;;  %v317_v62 = vmax.f32 %v309_v55, 0.0 }
  0x28   : > { %522 = vmatmul.msk.f32.vlgmr.msra.gmra.mxu1 %vm331_vm0, %v320_v53  ;;  %v303_v63 = vadd.f32 %v784_v4, %v295_v56  ;;  %v297_v0 = vmul.f32 %v779_v3, %v515_v52  ;;  %v323_v1 = vadd.f32 %v315_v58, %v291_v57  ;;  %v594_v3 = vld [vmem:[%s877_s3] ss:$0 sm:$0xff] }
  0x29   : > { %v287_v2 = vmax.f32 %v279_v59, 0.0  ;;  %v281_v5 = vadd.f32 %v784_v4, %v272_v60  ;;  %v325_v6 = vadd.f32 %v317_v62, %v293_v61 }
  0x2a   : > { %v311_v7 = vmax.f32 %v303_v63, 0.0  ;;  %v305_v8 = vadd.f32 %v784_v4, %v297_v0 }
  0x2b   : > { %v289_v9 = vmax.f32 %v281_v5, 0.0 }
  0x2c   : > { %v319_v10 = vadd.f32 %v311_v7, %v287_v2  ;;  %v313_v11 = vmax.f32 %v305_v8, 0.0 }
  0x2d   : > { %525 = vmatmul.msk.f32.gmra.mxu2 %vm331_vm0, %v323_v1 }
  0x2e   : > { %527 = vmatmul.msk.f32.gmra.mxu3 %vm331_vm0, %v325_v6  ;;  %v321_v12 = vadd.f32 %v313_v11, %v289_v9 }
  0x2f   : > { %521 = vmatmul.msk.f32.gmra.mxu0 %vm331_vm0, %v319_v10 }
  0x30   : > { %523 = vmatmul.msk.f32.gmra.mxu1 %vm331_vm0, %v321_v12 }
  0xa4   : > { %v373_v4 = vpop.f32.mrf.mxu0 }
  0xa5   : > { %v374_v13 = vadd.f32 %v594_v3, %v373_v4  ;;  %v379_v14 = vpop.f32.mrf.mxu1 }
  0xa6   : > { %v380_v15 = vadd.f32 %v594_v3, %v379_v14 }
  0xa7   : > { %398 = vst.msk [vmem:[%s247_s10] sm:$0xff] %vm397_vm1, %v374_v13 }
  0xa8   : > { %400 = vst.msk [vmem:[%s247_s10 + $0x10] sm:$0xff] %vm397_vm1, %v380_v15  ;;  %v385_v16 = vpop.f32.mrf.mxu2 }
  0xa9   : > { %v391_v17 = vpop.f32.mrf.mxu3  ;;  %v386_v18 = vadd.f32 %v594_v3, %v385_v16 }
  0xaa   : > { %v392_v19 = vadd.f32 %v594_v3, %v391_v17 }
  0xab   : > { %402 = vst.msk [vmem:[%s247_s10 + $0x20] sm:$0xff] %vm397_vm1, %v386_v18 }
  0xac   : > { %v376_v20 = vpop.f32.mrf.mxu0  ;;  %404 = vst.msk [vmem:[%s247_s10 + $0x30] sm:$0xff] %vm397_vm1, %v392_v19 }
  0xad   : > { %v377_v21 = vadd.f32 %v594_v3, %v376_v20  ;;  %v382_v22 = vpop.f32.mrf.mxu1 }
  0xae   : > { %v383_v23 = vadd.f32 %v594_v3, %v382_v22 }
  0xaf   : > { %399 = vst.msk [vmem:[%s247_s10 + $0x8] sm:$0xff] %vm397_vm1, %v377_v21 }
  0xb0   : > { %401 = vst.msk [vmem:[%s247_s10 + $0x18] sm:$0xff] %vm397_vm1, %v383_v23  ;;  %v388_v24 = vpop.f32.mrf.mxu2 }
  0xb1   : > { %v394_v25 = vpop.f32.mrf.mxu3  ;;  %v389_v26 = vadd.f32 %v594_v3, %v388_v24 }
  0xb2   : > { %v395_v27 = vadd.f32 %v594_v3, %v394_v25 }
  0xb3   : > { %403 = vst.msk [vmem:[%s247_s10 + $0x28] sm:$0xff] %vm397_vm1, %v389_v26 }
  0xb4   : > { %405 = vst.msk [vmem:[%s247_s10 + $0x38] sm:$0xff] %vm397_vm1, %v395_v27 }
  0xb5 PF: > { %s17_s20 = sadd.s32 1, %s675_s20   ;;  %s881_s15 = smov %s659_s16 }
  0xb6   : > { %p14_p0 = scmp.ge.s32.totalorder %s17_s20, 4   ;;  %s882_s16 = smov %s663_s17 }
  0xb7   : > { %s883_s17 = smov %s753_s27  ;;  %s884_s18 = smov %s671_s19 }
  0xb8   : > { %s885_s19 = smov %s887_s22  ;;  %16 = sbr.rel (!%p14_p0) target bundleno = 4 (0x4), region = 77 }
  0xbd   :  { %436 = vsyncpa [#allocation3], 1 }
  0xbe   :  { %438 = vsyncpa [#allocation3 + $0x1], 1 }

</bundles_post_ra>
